<compile_context>
chip_gen: v5e
topology: v5e:2x2
jax: 0.10.0
libtpu: 0.0.40
codegen_flags: <defaults>
</compile_context>

<pallas_src>
import math
import functools

import jax
import jax.numpy as jnp
from jax import lax
from jax.experimental import pallas as pl
from jax.experimental.pallas import tpu as pltpu

# ---- module hyper-parameters (defaults of ArcMarginProduct) ----
IN_FEATURES = 128
OUT_FEATURES = 200
S = 32.0
M = 0.5
EASY_MARGIN = False

COS_M = math.cos(M)
SIN_M = math.sin(M)
TH = math.cos(math.pi - M)
MM = math.sin(math.pi - M) * M

_EPS = 1e-12  # matches torch.nn.functional.normalize default eps


def arc_margin_kernel(x_ref, wt_ref, inv_w_ref, label_ref, out_ref):
    x = x_ref[...]            # (TB, D)  f32
    wt = wt_ref[...]          # (D, Cp)  f32  (pre-transposed, class dim = lanes)
    inv_w = inv_w_ref[...]    # (1, Cp)  f32  (precomputed inverse class norms)
    label = label_ref[...]    # (TB, 1)  int32

    # Raw contraction on the MXU; rescale afterwards instead of normalizing
    # both operands elementwise.
    cos_raw = jnp.dot(x, wt, preferred_element_type=jnp.float32)    # (TB, Cp)

    # Inverse L2 norm of each x row; rsqrt lowers to the EUP (free slot).
    x_sq = jnp.sum(x * x, axis=-1, keepdims=True)                   # (TB, 1)
    inv_x = lax.rsqrt(jnp.maximum(x_sq, _EPS * _EPS))

    cosine = cos_raw * inv_x * inv_w                                 # (TB, Cp)

    # sine = sqrt(clamp(1 - cosine^2, 0))  -- single vmax instead of cmp+select
    sine = jnp.sqrt(jnp.maximum(1.0 - cosine * cosine, 0.0))
    phi = cosine * COS_M - sine * SIN_M
    if EASY_MARGIN:
        phi = jnp.where(cosine > 0.0, phi, cosine)
    else:
        phi = jnp.where(cosine - TH > 0.0, phi, cosine - MM)

    # one-hot blend as a single vselect per element
    tb, cp = cosine.shape
    class_ids = lax.broadcasted_iota(jnp.int32, (tb, cp), 1)
    blended = jnp.where(class_ids == label, phi, cosine)   # label broadcasts (TB,1)
    out_ref[...] = (blended * S).astype(out_ref.dtype)


def _round_up(v, m):
    return ((v + m - 1) // m) * m


@functools.partial(jax.jit, static_argnames=("tb",))
def arc_margin_forward(x, weight, label, *, tb=128):
    """x: (B, D) f32, weight: (C, D) f32, label: (B,) int -> (B, C) f32.

    Implements the testing=False path of ArcMarginProduct.forward.
    """
    b, d = x.shape
    c = weight.shape[0]

    c_pad = _round_up(c, 128)                         # lane-dense class dim
    tb = max(8, min(_round_up(tb, 8), _round_up(b, 8)))
    b_pad = _round_up(b, tb)

    # Pre-transpose weight to (D, C), zero-pad classes to c_pad, and compute
    # the per-class inverse norms with one XLA reduce in the wrapper.
    w_t = jnp.zeros((d, c_pad), jnp.float32).at[:, :c].set(
        weight.T.astype(jnp.float32))
    inv_w = lax.rsqrt(
        jnp.maximum(jnp.sum(w_t * w_t, axis=0, keepdims=True), _EPS * _EPS))

    # Pad batch; padded labels are -1 (never match a class id).
    x_p = jnp.zeros((b_pad, d), jnp.float32).at[:b].set(x.astype(jnp.float32))
    lbl = jnp.full((b_pad, 1), -1, jnp.int32).at[:b, 0].set(
        label.astype(jnp.int32))

    out = pl.pallas_call(
        arc_margin_kernel,
        out_shape=jax.ShapeDtypeStruct((b_pad, c_pad), jnp.float32),
        grid_spec=pltpu.PrefetchScalarGridSpec(
            num_scalar_prefetch=0,
            grid=(b_pad // tb,),
            in_specs=[
                pl.BlockSpec((tb, d), lambda i: (i, 0)),
                pl.BlockSpec((d, c_pad), lambda i: (0, 0)),   # resident weight
                pl.BlockSpec((1, c_pad), lambda i: (0, 0)),   # resident inv norms
                pl.BlockSpec((tb, 1), lambda i: (i, 0)),
            ],
            out_specs=pl.BlockSpec((tb, c_pad), lambda i: (i, 0)),
        ),
        compiler_params=pltpu.CompilerParams(
            dimension_semantics=("parallel",)),   # megacore sharding on v7x
    )(x_p, w_t, inv_w, lbl)

    return out[:b, :c]


def _reference(x, weight, label):
    x_n = x / jnp.maximum(jnp.linalg.norm(x, axis=1, keepdims=True), _EPS)
    w_n = weight / jnp.maximum(jnp.linalg.norm(weight, axis=1, keepdims=True), _EPS)
    cosine = x_n @ w_n.T
    sine = jnp.sqrt(jnp.maximum(1.0 - cosine ** 2, 0.0))
    phi = cosine * COS_M - sine * SIN_M
    phi = jnp.where(cosine - TH > 0.0, phi, cosine - MM)
    one_hot = jax.nn.one_hot(label, OUT_FEATURES, dtype=jnp.float32)
    return (one_hot * phi + (1.0 - one_hot) * cosine) * S


if __name__ == "__main__":
    key = jax.random.PRNGKey(0)
    kx, kw, kl = jax.random.split(key, 3)

    B = 8
    x = jax.random.normal(kx, (B, IN_FEATURES), dtype=jnp.float32)

    # xavier_uniform_ init: U(-a, a), a = sqrt(6 / (fan_in + fan_out))
    bound = math.sqrt(6.0 / (IN_FEATURES + OUT_FEATURES))
    weight = jax.random.uniform(
        kw, (OUT_FEATURES, IN_FEATURES), dtype=jnp.float32,
        minval=-bound, maxval=bound)

    label = jax.random.randint(kl, (B,), 0, OUT_FEATURES, dtype=jnp.int32)

    out = arc_margin_forward(x, weight, label)
    out = jax.block_until_ready(out)

    ref = _reference(x, weight, label)
    assert out.shape == (B, OUT_FEATURES)
    assert jnp.allclose(out, ref, atol=1e-4, rtol=1e-4), "mismatch vs reference"

    # TODO(synk): testing=True branch returns (s*margined, s*cosine); only the
    # default testing=False path is implemented in the kernel.
    print("KERNEL_OK")
</pallas_src>

<mosaic_0001>
module attributes {stable_mosaic.version = 11 : i64} {
  func.func @arc_margin_kernel(%arg0: i32, %arg1: memref<8x128xf32, #tpu.memory_space<vmem>>, %arg2: memref<128x256xf32, #tpu.memory_space<vmem>>, %arg3: memref<1x256xf32, #tpu.memory_space<vmem>>, %arg4: memref<8x1xi32, #tpu.memory_space<vmem>>, %arg5: memref<8x256xf32, #tpu.memory_space<vmem>>) attributes {dimension_semantics = [#tpu.dimension_semantics<parallel>], iteration_bounds = array<i64: 1>, scalar_prefetch = 0 : i64, scratch_operands = 0 : i64, tpu.core_type = #tpu.core_type<tc>, window_params = [{transform_indices = @transform_0, window_bounds = array<i64: 8, 128>}, {pipeline_mode = #tpu.pipeline_mode<synchronous>, transform_indices = @transform_1, window_bounds = array<i64: 128, 256>}, {pipeline_mode = #tpu.pipeline_mode<synchronous>, transform_indices = @transform_2, window_bounds = array<i64: 1, 256>}, {transform_indices = @transform_3, window_bounds = array<i64: 8, 1>}, {transform_indices = @transform_4, window_bounds = array<i64: 8, 256>}]} {
    %c0 = arith.constant 0 : index
    %c0_0 = arith.constant 0 : index
    %0 = vector.load %arg1[%c0, %c0_0] : memref<8x128xf32, #tpu.memory_space<vmem>>, vector<8x128xf32>
    %c0_1 = arith.constant 0 : index
    %c0_2 = arith.constant 0 : index
    %1 = vector.load %arg2[%c0_1, %c0_2] : memref<128x256xf32, #tpu.memory_space<vmem>>, vector<128x256xf32>
    %c0_3 = arith.constant 0 : index
    %c0_4 = arith.constant 0 : index
    %2 = vector.load %arg3[%c0_3, %c0_4] : memref<1x256xf32, #tpu.memory_space<vmem>>, vector<1x256xf32>
    %c0_5 = arith.constant 0 : index
    %c0_6 = arith.constant 0 : index
    %3 = vector.load %arg4[%c0_5, %c0_6] : memref<8x1xi32, #tpu.memory_space<vmem>>, vector<8x1xi32>
    %cst = arith.constant dense<0.000000e+00> : vector<8x256xf32>
    %4 = tpu.matmul %0, %1, %cst {dimension_numbers = #tpu.dot_dimension_numbers<[1], [0], [0], [1], [0, 0, 1, 1], [], []>} : vector<8x128xf32>, vector<128x256xf32>, vector<8x256xf32> -> vector<8x256xf32>
    %5 = arith.mulf %0, %0 : vector<8x128xf32>
    %cst_7 = arith.constant dense<0.000000e+00> : vector<8xf32>
    %6 = vector.multi_reduction <add>, %5, %cst_7 [1] : vector<8x128xf32> to vector<8xf32>
    %7 = vector.shape_cast %6 : vector<8xf32> to vector<8x1xf32>
    %cst_8 = arith.constant 1.000000e-24 : f32
    %8 = vector.broadcast %cst_8 : f32 to vector<8x1xf32>
    %9 = arith.maximumf %7, %8 : vector<8x1xf32>
    %10 = math.rsqrt %9 : vector<8x1xf32>
    %11 = vector.broadcast %10 : vector<8x1xf32> to vector<8x256xf32>
    %12 = arith.mulf %4, %11 : vector<8x256xf32>
    %13 = vector.broadcast %2 : vector<1x256xf32> to vector<8x256xf32>
    %14 = arith.mulf %12, %13 : vector<8x256xf32>
    %15 = arith.mulf %14, %14 : vector<8x256xf32>
    %cst_9 = arith.constant 1.000000e+00 : f32
    %16 = vector.broadcast %cst_9 : f32 to vector<8x256xf32>
    %17 = arith.subf %16, %15 : vector<8x256xf32>
    %cst_10 = arith.constant 0.000000e+00 : f32
    %18 = vector.broadcast %cst_10 : f32 to vector<8x256xf32>
    %19 = arith.maximumf %17, %18 : vector<8x256xf32>
    %20 = math.sqrt %19 : vector<8x256xf32>
    %cst_11 = arith.constant 0.87758255 : f32
    %21 = vector.broadcast %cst_11 : f32 to vector<8x256xf32>
    %22 = arith.mulf %14, %21 : vector<8x256xf32>
    %cst_12 = arith.constant 0.47942555 : f32
    %23 = vector.broadcast %cst_12 : f32 to vector<8x256xf32>
    %24 = arith.mulf %20, %23 : vector<8x256xf32>
    %25 = arith.subf %22, %24 : vector<8x256xf32>
    %cst_13 = arith.constant -0.87758255 : f32
    %26 = vector.broadcast %cst_13 : f32 to vector<8x256xf32>
    %27 = arith.subf %14, %26 : vector<8x256xf32>
    %cst_14 = arith.constant 0.000000e+00 : f32
    %28 = vector.broadcast %cst_14 : f32 to vector<8x256xf32>
    %29 = arith.cmpf ogt, %27, %28 : vector<8x256xf32>
    %cst_15 = arith.constant 0.239712775 : f32
    %30 = vector.broadcast %cst_15 : f32 to vector<8x256xf32>
    %31 = arith.subf %14, %30 : vector<8x256xf32>
    %32 = arith.select %29, %25, %31 : vector<8x256xi1>, vector<8x256xf32>
    %33 = tpu.iota {dimensions = array<i32: 1>} : vector<8x256xi32>
    %34 = vector.broadcast %3 : vector<8x1xi32> to vector<8x256xi32>
    %35 = arith.cmpi eq, %33, %34 : vector<8x256xi32>
    %36 = arith.select %35, %32, %14 : vector<8x256xi1>, vector<8x256xf32>
    %cst_16 = arith.constant 3.200000e+01 : f32
    %37 = vector.broadcast %cst_16 : f32 to vector<8x256xf32>
    %38 = arith.mulf %36, %37 : vector<8x256xf32>
    %c0_17 = arith.constant 0 : index
    %c0_18 = arith.constant 0 : index
    %39 = vector.load %arg5[%c0_17, %c0_18] : memref<8x256xf32, #tpu.memory_space<vmem>>, vector<8x256xf32>
    tpu.vector_store %arg5[%c0_17, %c0_18], %38 {strides = array<i32>} : memref<8x256xf32, #tpu.memory_space<vmem>>, vector<8x256xf32>,
    return
  }
  func.func @transform_0(%arg0: i32) -> (i32, i32) {
    %c0_i32 = arith.constant 0 : i32
    %c0_i32_0 = arith.constant 0 : i32
    return %arg0, %c0_i32 : i32, i32
  }
  func.func @transform_1(%arg0: i32) -> (i32, i32) {
    %c0_i32 = arith.constant 0 : i32
    %c0_i32_0 = arith.constant 0 : i32
    %c0_i32_1 = arith.constant 0 : i32
    return %c0_i32, %c0_i32_0 : i32, i32
  }
  func.func @transform_2(%arg0: i32) -> (i32, i32) {
    %c0_i32 = arith.constant 0 : i32
    %c0_i32_0 = arith.constant 0 : i32
    %c0_i32_1 = arith.constant 0 : i32
    return %c0_i32, %c0_i32_0 : i32, i32
  }
  func.func @transform_3(%arg0: i32) -> (i32, i32) {
    %c0_i32 = arith.constant 0 : i32
    %c0_i32_0 = arith.constant 0 : i32
    return %arg0, %c0_i32 : i32, i32
  }
  func.func @transform_4(%arg0: i32) -> (i32, i32) {
    %c0_i32 = arith.constant 0 : i32
    %c0_i32_0 = arith.constant 0 : i32
    return %arg0, %c0_i32 : i32, i32
  }
}

</mosaic_0001>

<bundles_post_ra>
// kernel: arc_margin_forward.1
= control target key start
LH: loop header
LB: loop body
LE: loop exit
PB: predicated region body
PF: predicated region fallthrough
CT: control target
= control target key end

     0   :  { %v229_v7 = vmov 0   ;;  %s370_s0 = inlined_call_operand.vmem [shape: f32[8,128], index: 0, kind: input, shape index: {}]   ;;  %s371_s1 = inlined_call_operand.vmem [shape: f32[128,256], index: 1, kind: input, shape index: {}]   ;;  %s372_s2 = inlined_call_operand.vmem [shape: f32[1,256], index: 2, kind: input, shape index: {}]   ;;  %s373_s3 = inlined_call_operand.vmem [shape: s32[8,1], index: 3, kind: input, shape index: {}]   ;;  %s374_s4 = inlined_call_operand.hbm [shape: f32[8,256], index: 4, kind: output, shape index: {}]  }
   0x1   :  { %v49_v0 = vld [vmem:[%s371_s1 + $0xf0] sm:$0xff]  ;;  %v50_v1 = vld [vmem:[%s371_s1 + $0xf8] sm:$0xff]  ;;  %v47_v2 = vld [vmem:[%s371_s1 + $0xe0] sm:$0xff]  ;;  %196 = vset.pattern.permute.xlu0 %v229_v7 }
   0x2   :  { %53 = vmatpush.msra.mxu0 %v49_v0  ;;  %73 = vmatpush.msra.mxu1 %v50_v1  ;;  %v48_v3 = vld [vmem:[%s371_s1 + $0xe8] sm:$0xff]  ;;  %v45_v4 = vld [vmem:[%s371_s1 + $0xd0] sm:$0xff]  ;;  %v46_v5 = vld [vmem:[%s371_s1 + $0xd8] sm:$0xff] }
   0x3   :  { %v277_v6 = vld [vmem:[%s370_s0] sm:$0xff]  ;;  %v44_v10 = vld [vmem:[%s371_s1 + $0xc8] sm:$0xff]  ;;  %v41_v11 = vld [vmem:[%s371_s1 + $0xb0] sm:$0xff] }
   0x4   :  { %54 = vmatpush.msra.mxu0 %v47_v2  ;;  %74 = vmatpush.msra.mxu1 %v48_v3  ;;  %v93_v8 = vmul.f32 %v277_v6, %v277_v6  ;;  %v43_v9 = vld [vmem:[%s371_s1 + $0xc0] sm:$0xff]  ;;  %v42_v12 = vld [vmem:[%s371_s1 + $0xb8] sm:$0xff]  ;;  %v40_v14 = vld [vmem:[%s371_s1 + $0xa8] sm:$0xff] }
   0x5   :  { %v39_v13 = vld [vmem:[%s371_s1 + $0xa0] sm:$0xff]  ;;  %v37_v15 = vld [vmem:[%s371_s1 + $0x90] sm:$0xff]  ;;  %v38_v16 = vld [vmem:[%s371_s1 + $0x98] sm:$0xff] }
   0x6   :  { %55 = vmatpush.msra.mxu0 %v45_v4  ;;  %75 = vmatpush.msra.mxu1 %v46_v5 }
   0x7   :  { %94 = vadd.xlane.f32.xlu0 %v93_v8 }
   0x8   :  { %56 = vmatpush.msra.mxu0 %v43_v9  ;;  %76 = vmatpush.msra.mxu1 %v44_v10 }
   0xa   :  { %57 = vmatpush.msra.mxu0 %v41_v11  ;;  %77 = vmatpush.msra.mxu1 %v42_v12 }
   0xc   :  { %58 = vmatpush.msra.mxu0 %v39_v13  ;;  %78 = vmatpush.msra.mxu1 %v40_v14 }
   0xd   :  { %9 = vsyncpa [#allocation3], 0  ;;  %v35_v17 = vld [vmem:[%s371_s1 + $0x80] sm:$0xff]  ;;  %v36_v18 = vld [vmem:[%s371_s1 + $0x88] sm:$0xff]  ;;  %v160_v1 = vlaneseq  ;;  %s181_s6 = sshll.u32 %s374_s4, 4  ;;  %s182_s6 = int_to_ptr.hbm [resolvable:$true] %s181_s6 }
   0xe   :  { %59 = vmatpush.msra.mxu0 %v37_v15  ;;  %79 = vmatpush.msra.mxu1 %v38_v16  ;;  %v33_v19 = vld [vmem:[%s371_s1 + $0x70] sm:$0xff]  ;;  %v34_v20 = vld [vmem:[%s371_s1 + $0x78] sm:$0xff]  ;;  %v31_v21 = vld [vmem:[%s371_s1 + $0x60] sm:$0xff] }
   0xf   :  { %v32_v22 = vld [vmem:[%s371_s1 + $0x68] sm:$0xff]  ;;  %v29_v23 = vld [vmem:[%s371_s1 + $0x50] sm:$0xff]  ;;  %v30_v24 = vld [vmem:[%s371_s1 + $0x58] sm:$0xff] }
  0x10   :  { %60 = vmatpush.msra.mxu0 %v35_v17  ;;  %80 = vmatpush.msra.mxu1 %v36_v18  ;;  %v27_v25 = vld [vmem:[%s371_s1 + $0x40] sm:$0xff]  ;;  %v28_v26 = vld [vmem:[%s371_s1 + $0x48] sm:$0xff]  ;;  %v25_v27 = vld [vmem:[%s371_s1 + $0x30] sm:$0xff] }
  0x11   :  { %v26_v28 = vld [vmem:[%s371_s1 + $0x38] sm:$0xff]  ;;  %v52_v29 = vld [vmem:[%s373_s3] sm:$0xff]  ;;  %v24_v31 = vld [vmem:[%s371_s1 + $0x28] sm:$0xff] }
  0x12   :  { %61 = vmatpush.msra.mxu0 %v33_v19  ;;  %81 = vmatpush.msra.mxu1 %v34_v20  ;;  %v23_v30 = vld [vmem:[%s371_s1 + $0x20] sm:$0xff]  ;;  %v21_v32 = vld [vmem:[%s371_s1 + $0x10] sm:$0xff]  ;;  %v22_v33 = vld [vmem:[%s371_s1 + $0x18] sm:$0xff] }
  0x13   :  { %v19_v34 = vld [vmem:[%s371_s1] sm:$0xff]  ;;  %v20_v35 = vld [vmem:[%s371_s1 + $0x8] sm:$0xff] }
  0x14   :  { %62 = vmatpush.msra.mxu0 %v31_v21  ;;  %82 = vmatpush.msra.mxu1 %v32_v22  ;;  %v51_v43 = vld [vmem:[%s372_s2] sm:$0x3]  ;;  %s230_s2 = smov [#allocation2]  }
  0x15   :  { %v110_v45 = vperm.slane %v51_v43, 0  ;;  %v111_v46 = vperm.slane %v51_v43, 1  ;;  %s179_s29 = sshll.u32 %s230_s2, 4  ;;  %s180_s29 = int_to_ptr.vmem [resolvable:$true] %s179_s29 }
  0x16   :  { %63 = vmatpush.msra.mxu0 %v29_v23  ;;  %83 = vmatpush.msra.mxu1 %v30_v24 }
  0x18   :  { %64 = vmatpush.msra.mxu0 %v27_v25  ;;  %84 = vmatpush.msra.mxu1 %v28_v26 }
  0x1a   :  { %65 = vmatpush.msra.mxu0 %v25_v27  ;;  %85 = vmatpush.msra.mxu1 %v26_v28 }
  0x1b   :  { %164 = vperm.xlu0 %196, %v52_v29  }
  0x1c   :  { %66 = vmatpush.msra.mxu0 %v23_v30  ;;  %86 = vmatpush.msra.mxu1 %v24_v31 }
  0x1e   :  { %67 = vmatpush.msra.mxu0 %v21_v32  ;;  %87 = vmatpush.msra.mxu1 %v22_v33 }
  0x20   :  { %68 = vmatpush.msra.mxu0 %v19_v34  ;;  %88 = vmatpush.msra.mxu1 %v20_v35 }
  0x21   :  { %69 = vmatmul.f32.vlgmr.msra.gmra.mxu0 %v277_v6  ;;  %89 = vmatmul.f32.vlgmr.msra.gmra.mxu1 %v277_v6  ;;  %v161_v6 = vand.u32 127, %v160_v1 }
  0x23   :  { %v162_v11 = vadd.s32 128, %v161_v6 }
  0x7a   :  { %v95_v36 = vpop.xlane.xlu0 %94 }
  0x7b   :  { %v96_v37 = vmax.f32 %v95_v36, 1e-24 }
  0x7d   :  { %197 = vrsqrt.f32 %v96_v37  ;;  %vm103_vm0 = vweird.f32 %v96_v37 }
  0x83   :  { %v198_v38 = vpop.eup %197 }
  0x84   :  { %v98_v39 = vmul.f32 %v198_v38, %v96_v37  ;;  %vm104_vm1 = vweird.f32 %v198_v38 }
  0x85   :  { %vm105_vm2 = vmor %vm103_vm0, %vm104_vm1 }
  0x86   :  { %v99_v40 = vmul.f32 %v198_v38, %v98_v39 }
  0x88   :  { %v100_v41 = vmul.f32 0.5, %v99_v40 }
  0x8a   :  { %v101_v42 = vsub.f32 1.5, %v100_v41 }
  0x8c   :  { %v102_v44 = vmul.f32 %v198_v38, %v101_v42 }
  0x8d   :  { %v165_v16 = vpop.permute.xlu0 %164 }
  0x8e   :  { %v106_v48 = vsel %vm105_vm2, %v198_v38, %v102_v44  ;;  %vm166_vm7 = vcmp.eq.s32.totalorder %v161_v6, %v165_v16  ;;  %vm167_vm9 = vcmp.eq.s32.totalorder %v162_v11, %v165_v16 }
  0x9e   :  { %v70_v47 = vpop.f32.mrf.mxu0  ;;  %v90_v49 = vpop.f32.mrf.mxu1 }
  0x9f   :  { %v107_v50 = vmul.f32 %v106_v48, %v70_v47  ;;  %v108_v51 = vmul.f32 %v106_v48, %v90_v49 }
  0xa1   :  { %v114_v52 = vmul.f32 %v110_v45, %v107_v50  ;;  %v115_v53 = vmul.f32 %v111_v46, %v108_v51 }
  0xa3   :  { %v116_v54 = vmul.f32 %v114_v52, %v114_v52  ;;  %v117_v55 = vmul.f32 %v115_v53, %v115_v53  ;;  %v190_v19 = vadd.f32 0.87758255, %v114_v52  ;;  %v146_v21 = vmul.f32 0.87758255, %v114_v52 }
  0xa4   :  { %v191_v23 = vadd.f32 0.87758255, %v115_v53  ;;  %v147_v24 = vmul.f32 0.87758255, %v115_v53  ;;  %v192_v27 = vadd.f32 -0.23971277, %v114_v52 }
  0xa5   :  { %v118_v56 = vsub.f32 1.0, %v116_v54  ;;  %v119_v57 = vsub.f32 1.0, %v117_v55  ;;  %vm154_vm8 = vcmp.gt.f32.partialorder %v190_v19, 0.0  ;;  %v193_v29 = vadd.f32 -0.23971277, %v115_v53 }
  0xa6   :  { %vm155_vm10 = vcmp.gt.f32.partialorder %v191_v23, 0.0 }
  0xa7   :  { %v120_v58 = vmax.f32 %v118_v56, 0.0  ;;  %v121_v59 = vmax.f32 %v119_v57, 0.0 }
  0xa9   :  { %199 = vrsqrt.f32 %v120_v58  ;;  %vm129_vm3 = vcmp.eq.f32.partialorder %v120_v58, inf  ;;  %v132_v12 = vand.u32 2147483648, %v120_v58  ;;  %vm131_vm4 = vcmp.eq.f32.partialorder %v120_v58, 0.0 }
  0xaa   :  { %201 = vrsqrt.f32 %v121_v59  ;;  %vm141_vm5 = vcmp.eq.f32.partialorder %v121_v59, inf  ;;  %v144_v15 = vand.u32 2147483648, %v121_v59  ;;  %vm143_vm6 = vcmp.eq.f32.partialorder %v121_v59, 0.0 }
  0xaf   :  { %v200_v60 = vpop.eup %199 }
  0xb0   :  { %v202_v61 = vpop.eup %201  ;;  %v123_v62 = vmul.f32 %v200_v60, %v120_v58 }
  0xb1   :  { %v135_v63 = vmul.f32 %v202_v61, %v121_v59 }
  0xb2   :  { %v124_v0 = vmul.f32 %v200_v60, %v123_v62 }
  0xb3   :  { %v136_v2 = vmul.f32 %v202_v61, %v135_v63 }
  0xb4   :  { %v125_v3 = vmul.f32 0.5, %v124_v0 }
  0xb5   :  { %v137_v4 = vmul.f32 0.5, %v136_v2 }
  0xb6   :  { %v126_v5 = vsub.f32 1.5, %v125_v3 }
  0xb7   :  { %v138_v7 = vsub.f32 1.5, %v137_v4 }
  0xb8   :  { %v127_v8 = vmul.f32 %v200_v60, %v126_v5 }
  0xb9   :  { %v139_v9 = vmul.f32 %v202_v61, %v138_v7 }
  0xba   :  { %v128_v10 = vmul.f32 %v127_v8, %v120_v58 }
  0xbb   :  { %v140_v13 = vmul.f32 %v139_v9, %v121_v59 }
  0xbc   :  { %v130_v14 = vsel %vm129_vm3, %v120_v58, %v128_v10 }
  0xbd   :  { %v133_v17 = vsel %vm131_vm4, %v132_v12, %v130_v14  ;;  %v142_v18 = vsel %vm141_vm5, %v121_v59, %v140_v13 }
  0xbe   :  { %v145_v20 = vsel %vm143_vm6, %v144_v15, %v142_v18  ;;  %v148_v22 = vmul.f32 0.47942555, %v133_v17 }
  0xbf   :  { %v149_v25 = vmul.f32 0.47942555, %v145_v20 }
  0xc0   :  { %v150_v26 = vsub.f32 %v146_v21, %v148_v22 }
  0xc1   :  { %v151_v28 = vsub.f32 %v147_v24, %v149_v25 }
  0xc2   :  { %v158_v30 = vsel %vm154_vm8, %v150_v26, %v192_v27 }
  0xc3   :  { %v159_v31 = vsel %vm155_vm10, %v151_v28, %v193_v29  ;;  %v168_v32 = vsel %vm166_vm7, %v158_v30, %v114_v52 }
  0xc4   :  { %v169_v33 = vsel %vm167_vm9, %v159_v31, %v115_v53  ;;  %v170_v34 = vmul.f32 32.0, %v168_v32 }
  0xc5   :  { %v171_v35 = vmul.f32 32.0, %v169_v33 }
  0xc6   :  { %172 = vst [vmem:[#allocation2] sm:$0xff] %v170_v34 }
  0xc7   :  { %173 = vst [vmem:[#allocation2 + $0x8] sm:$0xff] %v171_v35 }
  0xc8   :  { %184 = dma.vmem_to_hbm [thread:$0]  %s180_s29, 256, %s182_s6, [#allocation3]  }
  0xc9   :  { %227 = dma.done.wait [#allocation3], 256  }
  0xca   :  { %228 = vsyncadd [#allocation3], 4294967040 }
  0xcb   :  { %189 = vsyncpa [#allocation3], 1 }

</bundles_post_ra>
